<compile_context>
chip_gen: v5e
topology: v5e:2x2
jax: 0.10.0
libtpu: 0.0.40
codegen_flags: <defaults>
</compile_context>

<pallas_src>
import jax
import jax.numpy as jnp
from jax.experimental import pallas as pl
from jax.experimental.pallas import tpu as pltpu


# ------------------------------ Pallas kernel ------------------------------ #

def _transition_kernel(x_ref, w_ref, b_ref, o_ref):
    # x_ref: (tr, 2, Wo, 2*Cin)  rows of (n, ho); dim1 = h-parity; lane = [wp0|wp1] x Cin
    # w_ref: (2*Cin, Cout)       0.25 * [W_eff ; W_eff]  (BN scale folded into W_eff)
    # b_ref: (1, Cout)           conv weight applied to BN shift
    # o_ref: (tr, Wo, Cout)
    v = x_ref[...]                                   # (tr, 2, Wo, 2*Cin)
    hsum = v[:, 0] + v[:, 1]                         # sum over h-parity -> (tr, Wo, 2*Cin)
    tr, wo, k = hsum.shape
    flat = hsum.reshape(tr * wo, k)                  # collapse leading dims (free if Wo%8==0)
    y = jnp.dot(flat, w_ref[...], preferred_element_type=jnp.float32)
    y = y + b_ref[...]                               # bias (BN shift through the conv)
    o_ref[...] = y.reshape(tr, wo, -1).astype(o_ref.dtype)


def _pooled_pointwise_conv(xr, w_big, bias, *, target_block_bytes=4 << 20):
    """out[r, wo, :] = 0.25 * sum_{2x2 window} x @ W_eff + bias, tiled over rows."""
    R, _, Wo, K = xr.shape
    Cout = w_big.shape[1]

    # Row-tile sized to ~target_block_bytes of input per block; keep >=2 blocks
    # when possible so the parallel grid axis can shard across TensorCores.
    row_bytes = 2 * Wo * K * xr.dtype.itemsize
    tr = max(1, target_block_bytes // max(1, row_bytes))
    tr = min(tr, R, -(-R // 2) if R > 1 else R)

    grid = (pl.cdiv(R, tr),)
    return pl.pallas_call(
        _transition_kernel,
        out_shape=jax.ShapeDtypeStruct((R, Wo, Cout), xr.dtype),
        grid_spec=pltpu.PrefetchScalarGridSpec(
            num_scalar_prefetch=0,
            grid=grid,
            in_specs=[
                pl.BlockSpec((tr, 2, Wo, K), lambda i: (i, 0, 0, 0)),
                pl.BlockSpec((K, Cout), lambda i: (0, 0)),
                pl.BlockSpec((1, Cout), lambda i: (0, 0)),
            ],
            out_specs=pl.BlockSpec((tr, Wo, Cout), lambda i: (i, 0, 0)),
        ),
        compiler_params=pltpu.CompilerParams(dimension_semantics=("parallel",)),
    )(xr, w_big, bias)


# -------------------------------- wrapper ----------------------------------- #

def transition_forward(x_nchw, params, *, eps=1e-5):
    """Pallas implementation of Transition.forward (eval-mode BN). NCHW in/out."""
    w = params["conv_w"].astype(jnp.float32)               # (Cout, Cin), 1x1 conv
    scale = params["gamma"] / jnp.sqrt(params["var"] + eps)
    shift = params["beta"] - params["mean"] * scale

    w_eff = (w * scale[None, :]).T                          # (Cin, Cout): BN scale folded
    b_eff = w @ shift                                       # (Cout,): BN shift through conv
    # Fold the 2x2 average pool into the contraction: the lane dim of the reshaped
    # input is [w-parity 0 channels | w-parity 1 channels].
    w_big = 0.25 * jnp.concatenate([w_eff, w_eff], axis=0)  # (2*Cin, Cout)

    x = jnp.transpose(x_nchw, (0, 2, 3, 1))                 # NCHW -> NHWC (channels on lanes)
    N, H, W, Cin = x.shape
    Ho, Wo = H // 2, W // 2
    x = x[:, : 2 * Ho, : 2 * Wo, :]                         # AvgPool2d floor behaviour
    xr = x.reshape(N * Ho, 2, Wo, 2 * Cin)                  # contiguous (free) reshape

    out = _pooled_pointwise_conv(xr, w_big, b_eff.reshape(1, -1))   # (N*Ho, Wo, Cout)
    out = out.reshape(N, Ho, Wo, -1)
    return jnp.transpose(out, (0, 3, 1, 2))                 # NHWC -> NCHW


# --------------------------- reference (pure JAX) ---------------------------- #

def reference_forward(x_nchw, params, *, eps=1e-5):
    scale = params["gamma"] / jnp.sqrt(params["var"] + eps)
    shift = params["beta"] - params["mean"] * scale
    xb = x_nchw * scale[None, :, None, None] + shift[None, :, None, None]
    y = jnp.einsum("nchw,oc->nohw", xb, params["conv_w"])
    N, Co, H, W = y.shape
    Ho, Wo = H // 2, W // 2
    y = y[:, :, : 2 * Ho, : 2 * Wo]
    return y.reshape(N, Co, Ho, 2, Wo, 2).mean(axis=(3, 5))


# ------------------------------- param setup --------------------------------- #

def make_params(key, in_channels, out_channels):
    ks = jax.random.split(key, 5)
    return {
        "gamma": 1.0 + 0.1 * jax.random.normal(ks[0], (in_channels,), jnp.float32),
        "beta": 0.1 * jax.random.normal(ks[1], (in_channels,), jnp.float32),
        "mean": 0.1 * jax.random.normal(ks[2], (in_channels,), jnp.float32),
        "var": jnp.abs(jax.random.normal(ks[3], (in_channels,), jnp.float32)) + 0.5,
        "conv_w": 0.1 * jax.random.normal(ks[4], (out_channels, in_channels), jnp.float32),
    }


# ----------------------------------- main ------------------------------------ #

if __name__ == "__main__":
    key = jax.random.PRNGKey(0)
    kx, kp = jax.random.split(key)

    batch, in_channels, out_channels, spatial = 2, 4, 8, 16
    x = jax.random.normal(kx, (batch, in_channels, spatial, spatial), jnp.float32)
    params = make_params(kp, in_channels, out_channels)

    out = jax.block_until_ready(transition_forward(x, params))
    ref = jax.block_until_ready(reference_forward(x, params))

    assert out.shape == ref.shape == (batch, out_channels, spatial // 2, spatial // 2), \
        (out.shape, ref.shape)
    max_err = float(jnp.max(jnp.abs(out - ref)))
    assert jnp.allclose(out, ref, atol=1e-4, rtol=1e-4), max_err
    print("KERNEL_OK")
</pallas_src>

<mosaic_0001>
module attributes {stable_mosaic.version = 11 : i64} {
  func.func @_transition_kernel(%arg0: i32, %arg1: memref<8x2x8x8xf32, #tpu.memory_space<vmem>>, %arg2: memref<8x8xf32, #tpu.memory_space<vmem>>, %arg3: memref<1x8xf32, #tpu.memory_space<vmem>>, %arg4: memref<8x8x8xf32, #tpu.memory_space<vmem>>) attributes {dimension_semantics = [#tpu.dimension_semantics<parallel>], iteration_bounds = array<i64: 2>, scalar_prefetch = 0 : i64, scratch_operands = 0 : i64, tpu.core_type = #tpu.core_type<tc>, window_params = [{transform_indices = @transform_0, window_bounds = array<i64: 8, 2, 8, 8>}, {pipeline_mode = #tpu.pipeline_mode<synchronous>, transform_indices = @transform_1, window_bounds = array<i64: 8, 8>}, {pipeline_mode = #tpu.pipeline_mode<synchronous>, transform_indices = @transform_2, window_bounds = array<i64: 1, 8>}, {transform_indices = @transform_3, window_bounds = array<i64: 8, 8, 8>}]} {
    %c0 = arith.constant 0 : index
    %c0_0 = arith.constant 0 : index
    %c0_1 = arith.constant 0 : index
    %c0_2 = arith.constant 0 : index
    %0 = vector.load %arg1[%c0, %c0_0, %c0_1, %c0_2] : memref<8x2x8x8xf32, #tpu.memory_space<vmem>>, vector<8x2x8x8xf32>
    %1 = vector.extract_strided_slice %0 {offsets = [0, 0, 0, 0], sizes = [8, 1, 8, 8], strides = [1, 1, 1, 1]} : vector<8x2x8x8xf32> to vector<8x1x8x8xf32>
    %2 = vector.shape_cast %1 : vector<8x1x8x8xf32> to vector<8x8x8xf32>
    %3 = vector.extract_strided_slice %0 {offsets = [0, 1, 0, 0], sizes = [8, 1, 8, 8], strides = [1, 1, 1, 1]} : vector<8x2x8x8xf32> to vector<8x1x8x8xf32>
    %4 = vector.shape_cast %3 : vector<8x1x8x8xf32> to vector<8x8x8xf32>
    %5 = arith.addf %2, %4 : vector<8x8x8xf32>
    %6 = vector.shape_cast %5 : vector<8x8x8xf32> to vector<64x8xf32>
    %c0_3 = arith.constant 0 : index
    %c0_4 = arith.constant 0 : index
    %7 = vector.load %arg2[%c0_3, %c0_4] : memref<8x8xf32, #tpu.memory_space<vmem>>, vector<8x8xf32>
    %cst = arith.constant dense<0.000000e+00> : vector<64x8xf32>
    %8 = tpu.matmul %6, %7, %cst {dimension_numbers = #tpu.dot_dimension_numbers<[1], [0], [0], [1], [0, 0, 1, 1], [], []>} : vector<64x8xf32>, vector<8x8xf32>, vector<64x8xf32> -> vector<64x8xf32>
    %c0_5 = arith.constant 0 : index
    %c0_6 = arith.constant 0 : index
    %9 = vector.load %arg3[%c0_5, %c0_6] : memref<1x8xf32, #tpu.memory_space<vmem>>, vector<1x8xf32>
    %10 = vector.broadcast %9 : vector<1x8xf32> to vector<64x8xf32>
    %11 = arith.addf %8, %10 : vector<64x8xf32>
    %12 = vector.shape_cast %11 : vector<64x8xf32> to vector<8x8x8xf32>
    %c0_7 = arith.constant 0 : index
    %c0_8 = arith.constant 0 : index
    %c0_9 = arith.constant 0 : index
    %13 = vector.load %arg4[%c0_7, %c0_8, %c0_9] : memref<8x8x8xf32, #tpu.memory_space<vmem>>, vector<8x8x8xf32>
    tpu.vector_store %arg4[%c0_7, %c0_8, %c0_9], %12 {strides = array<i32>} : memref<8x8x8xf32, #tpu.memory_space<vmem>>, vector<8x8x8xf32>,
    return
  }
  func.func @transform_0(%arg0: i32) -> (i32, i32, i32, i32) {
    %c0_i32 = arith.constant 0 : i32
    %c0_i32_0 = arith.constant 0 : i32
    %c0_i32_1 = arith.constant 0 : i32
    %c0_i32_2 = arith.constant 0 : i32
    return %arg0, %c0_i32, %c0_i32_0, %c0_i32_1 : i32, i32, i32, i32
  }
  func.func @transform_1(%arg0: i32) -> (i32, i32) {
    %c0_i32 = arith.constant 0 : i32
    %c0_i32_0 = arith.constant 0 : i32
    %c0_i32_1 = arith.constant 0 : i32
    return %c0_i32, %c0_i32_0 : i32, i32
  }
  func.func @transform_2(%arg0: i32) -> (i32, i32) {
    %c0_i32 = arith.constant 0 : i32
    %c0_i32_0 = arith.constant 0 : i32
    %c0_i32_1 = arith.constant 0 : i32
    return %c0_i32, %c0_i32_0 : i32, i32
  }
  func.func @transform_3(%arg0: i32) -> (i32, i32, i32) {
    %c0_i32 = arith.constant 0 : i32
    %c0_i32_0 = arith.constant 0 : i32
    %c0_i32_1 = arith.constant 0 : i32
    return %arg0, %c0_i32, %c0_i32_0 : i32, i32, i32
  }
}

</mosaic_0001>

<bundles_post_ra>
// kernel: tpu_custom_call.1
= control target key start
LH: loop header
LB: loop body
LE: loop exit
PB: predicated region body
PF: predicated region fallthrough
CT: control target
= control target key end

     0   :  { %s397_s12 = smov 0   ;;  %s440_s0 = inlined_call_operand.vmem [shape: f32[16,2,8,8], index: 0, kind: input, shape index: {}]   ;;  %s441_s1 = inlined_call_operand.vmem [shape: f32[8,8], index: 1, kind: input, shape index: {}]   ;;  %s442_s2 = inlined_call_operand.vmem [shape: f32[1,8], index: 2, kind: input, shape index: {}]   ;;  %s443_s3 = inlined_call_operand.vmem [shape: f32[16,8,8], index: 3, kind: output, shape index: {}]  }
   0x1 LB: > { %s336_s13 = sadd.s32 4294967295, %s375_s12   ;;  %p340_p0 = scmp.ge.s32.totalorder %s375_s12, 1  ;;  %s375_s12 = sphi %s397_s12, %s13_s12  }
   0x2   : > { %p139_p1 = scmp.lt.s32.totalorder %s375_s12, 3 }
   0x4   : > { %p140_p2 = pnand %p340_p0, %p139_p1 }
   0x5   : > { %s341_s16 = sshll.u32 (!%p140_p2), %s336_s13, 3 }
   0x6   : > { %143 = sbr.rel (%p140_p2) target bundleno = 161 (0xa1), region = 32  ;;  %p165_p3 = scmp.lt.s32.totalorder (!%p140_p2), %s341_s16, 15 }
   0xb   : > { %v201_v0 = vld [vmem:[%s441_s1] sm:$0xff]  ;;  %s445_s16 = smov (!%p165_p3, %s341_s16), 15  ;;  %vm206_vm0 = vcmask 64512  }
   0xc   : > { %358 = vmatpush.msra.mxu2 %v201_v0  ;;  %359 = vmatpush.msra.mxu3 %v201_v0  ;;  %s356_s17 = sshll.u32 %s445_s16, 4  ;;  %s345_s21 = sshll.u32 %s445_s16, 3  ;;  %v368_v25 = vld [vmem:[%s442_s2] ss:$0 sm:$0xff] }
   0xd   : > { %246 = vmatpush.msra.mxu0 %v201_v0  ;;  %357 = vmatpush.msra.mxu1 %v201_v0  ;;  %s169_s20 = scalar_lea.vmem %s440_s0, %s356_s17  ;;  %s175_s26 = scalar_lea.vmem %s443_s3, %s345_s21 }
   0xe   : > { %v185_v1 = vld [vmem:[%s169_s20 + $0x40] sm:$0xff]  ;;  %v186_v2 = vld [vmem:[%s169_s20 + $0x48] sm:$0xff]  ;;  %v187_v13 = vld [vmem:[%s169_s20 + $0x50] sm:$0xff] }
   0xf   : > { %v189_v3 = vld [vmem:[%s169_s20 + $0x60] sm:$0xff]  ;;  %v197_v4 = vadd.f32 %v186_v2, %v185_v1  ;;  %v190_v5 = vld [vmem:[%s169_s20 + $0x68] sm:$0xff]  ;;  %v188_v14 = vld [vmem:[%s169_s20 + $0x58] sm:$0xff] }
  0x10   : > { %v177_v6 = vld [vmem:[%s169_s20] sm:$0xff]  ;;  %v178_v7 = vld [vmem:[%s169_s20 + $0x8] sm:$0xff]  ;;  %v199_v8 = vadd.f32 %v190_v5, %v189_v3  ;;  %v191_v15 = vld [vmem:[%s169_s20 + $0x70] sm:$0xff]  ;;  %v198_v21 = vadd.f32 %v188_v14, %v187_v13 }
  0x11   : > { %v193_v9 = vadd.f32 %v178_v7, %v177_v6  ;;  %v181_v10 = vld [vmem:[%s169_s20 + $0x20] sm:$0xff]  ;;  %v182_v11 = vld [vmem:[%s169_s20 + $0x28] sm:$0xff]  ;;  %350 = vmatmul.msk.f32.vlgmr.msra.gmra.mxu2 %vm206_vm0, %v197_v4  ;;  %v192_v16 = vld [vmem:[%s169_s20 + $0x78] sm:$0xff] }
  0x12   : > { %v195_v12 = vadd.f32 %v182_v11, %v181_v10  ;;  %352 = vmatmul.msk.f32.vlgmr.msra.gmra.mxu3 %vm206_vm0, %v199_v8  ;;  %v179_v17 = vld [vmem:[%s169_s20 + $0x10] sm:$0xff]  ;;  %v180_v18 = vld [vmem:[%s169_s20 + $0x18] sm:$0xff]  ;;  %v200_v22 = vadd.f32 %v192_v16, %v191_v15 }
  0x13   : > { %346 = vmatmul.msk.f32.vlgmr.msra.gmra.mxu0 %vm206_vm0, %v193_v9  ;;  %v183_v19 = vld [vmem:[%s169_s20 + $0x30] sm:$0xff]  ;;  %v184_v20 = vld [vmem:[%s169_s20 + $0x38] sm:$0xff]  ;;  %v194_v23 = vadd.f32 %v180_v18, %v179_v17 }
  0x14   : > { %348 = vmatmul.msk.f32.vlgmr.msra.gmra.mxu1 %vm206_vm0, %v195_v12  ;;  %v196_v24 = vadd.f32 %v184_v20, %v183_v19 }
  0x19   : > { %351 = vmatmul.msk.f32.gmra.mxu2 %vm206_vm0, %v198_v21 }
  0x1a   : > { %353 = vmatmul.msk.f32.gmra.mxu3 %vm206_vm0, %v200_v22 }
  0x1b   : > { %347 = vmatmul.msk.f32.gmra.mxu0 %vm206_vm0, %v194_v23 }
  0x1c   : > { %349 = vmatmul.msk.f32.gmra.mxu1 %vm206_vm0, %v196_v24 }
  0x90   : > { %v248_v26 = vpop.f32.mrf.mxu0 }
  0x91   : > { %v249_v27 = vadd.f32 %v368_v25, %v248_v26  ;;  %v254_v28 = vpop.f32.mrf.mxu1 }
  0x92   : > { %v255_v29 = vadd.f32 %v368_v25, %v254_v28 }
  0x93   : > { %272 = vst.msk [vmem:[%s175_s26] sm:$0xff] %vm206_vm0, %v249_v27 }
  0x94   : > { %274 = vst.msk [vmem:[%s175_s26 + $0x10] sm:$0xff] %vm206_vm0, %v255_v29  ;;  %v260_v30 = vpop.f32.mrf.mxu2 }
  0x95   : > { %v261_v31 = vadd.f32 %v368_v25, %v260_v30  ;;  %v266_v32 = vpop.f32.mrf.mxu3 }
  0x96   : > { %v267_v33 = vadd.f32 %v368_v25, %v266_v32 }
  0x97   : > { %276 = vst.msk [vmem:[%s175_s26 + $0x20] sm:$0xff] %vm206_vm0, %v261_v31 }
  0x98   : > { %v251_v34 = vpop.f32.mrf.mxu0  ;;  %278 = vst.msk [vmem:[%s175_s26 + $0x30] sm:$0xff] %vm206_vm0, %v267_v33 }
  0x99   : > { %v252_v35 = vadd.f32 %v368_v25, %v251_v34  ;;  %v257_v36 = vpop.f32.mrf.mxu1 }
  0x9a   : > { %v258_v37 = vadd.f32 %v368_v25, %v257_v36 }
  0x9b   : > { %273 = vst.msk [vmem:[%s175_s26 + $0x8] sm:$0xff] %vm206_vm0, %v252_v35 }
  0x9c   : > { %275 = vst.msk [vmem:[%s175_s26 + $0x18] sm:$0xff] %vm206_vm0, %v258_v37  ;;  %v263_v38 = vpop.f32.mrf.mxu2 }
  0x9d   : > { %v264_v39 = vadd.f32 %v368_v25, %v263_v38  ;;  %v269_v40 = vpop.f32.mrf.mxu3 }
  0x9e   : > { %v270_v41 = vadd.f32 %v368_v25, %v269_v40 }
  0x9f   : > { %277 = vst.msk [vmem:[%s175_s26 + $0x28] sm:$0xff] %vm206_vm0, %v264_v39 }
  0xa0   : > { %279 = vst.msk [vmem:[%s175_s26 + $0x38] sm:$0xff] %vm206_vm0, %v270_v41 }
  0xa1 PF: > { %s13_s12 = sadd.s32 1, %s375_s12  }
  0xa2   : > { %p10_p4 = scmp.ge.s32.totalorder %s13_s12, 4  }
  0xa4   :  { %12 = sbr.rel (!%p10_p4) target bundleno = 1 (0x1), region = 62 }

</bundles_post_ra>
